<compile_context>
chip_gen: v5e
topology: v5e:2x2
jax: 0.10.0
libtpu: 0.0.40
codegen_flags: <defaults>
</compile_context>

<pallas_src>
import jax
import jax.numpy as jnp
from jax.experimental import pallas as pl
from jax.experimental.pallas import tpu as pltpu


def _uncertainty_kernel(packed_ref, out_ref):
    """packed_ref: (3, T) f32 VMEM block; rows 0/1/2 = init / final / w.

    out_ref: (1, 1) f32 SMEM scalar output.
    Hot-path math: one EUP exp over T lanes, two VALU ops, one XLU reduction.
    """
    init = packed_ref[0:1, :]    # (1, T) f32
    fin = packed_ref[1:2, :]     # (1, T) f32
    w = packed_ref[2:3, :]       # (1, T) f32

    # (init + fin) / (2*exp(w)) + w  , summed over tasks
    per_task = (init + fin) * (0.5 * jnp.exp(-w)) + w
    out_ref[0, 0] = jnp.sum(per_task)


def _uncertainty_forward(initial_losses, final_losses, weights):
    """initial_losses, final_losses, weights: 1-D f32 arrays of length T."""
    t = initial_losses.shape[0]

    # Single (3, T) f32 block: rows 0/1/2 = init / final / w. No padding.
    packed = jnp.stack(
        [initial_losses, final_losses, weights]).astype(jnp.float32)   # (3, T)

    out = pl.pallas_call(
        _uncertainty_kernel,
        out_shape=jax.ShapeDtypeStruct((1, 1), jnp.float32),
        in_specs=[pl.BlockSpec(memory_space=pltpu.MemorySpace.VMEM)],
        out_specs=pl.BlockSpec(memory_space=pltpu.MemorySpace.SMEM),
        cost_estimate=pl.CostEstimate(
            flops=6 * t, transcendentals=t, bytes_accessed=12 * t + 4),
    )(packed)
    return out[0, 0]


@jax.custom_vjp
def uncertainty_loss(initial_losses, final_losses, weights):
    return _uncertainty_forward(initial_losses, final_losses, weights)


def _uncertainty_fwd(initial_losses, final_losses, weights):
    out = _uncertainty_forward(initial_losses, final_losses, weights)
    return out, (initial_losses, final_losses, weights)


def _uncertainty_bwd(residuals, g):
    initial_losses, final_losses, weights = residuals
    half_exp_neg_w = 0.5 * jnp.exp(-weights)
    d_init = g * half_exp_neg_w
    d_fin = g * half_exp_neg_w
    d_w = g * (1.0 - (initial_losses + final_losses) * half_exp_neg_w)
    return d_init, d_fin, d_w


uncertainty_loss.defvjp(_uncertainty_fwd, _uncertainty_bwd)


def uncertainty_ref(initial_losses, final_losses, weights):
    """Pure-JAX reference mirroring the PyTorch forward loop."""
    total = 0.0
    for i in range(initial_losses.shape[0]):
        w = weights[i]
        total = total + initial_losses[i] / (2.0 * jnp.exp(w)) + 0.5 * w
        total = total + final_losses[i] / (2.0 * jnp.exp(w)) + 0.5 * w
    return total


if __name__ == "__main__":
    # Synthetic setup: 4 tasks (e.g. opt.TASKS.NAMES = ["semseg","depth","normals","edge"]).
    num_tasks = 4
    key = jax.random.PRNGKey(0)
    k1, k2 = jax.random.split(key)

    # Per-task scalar losses (positive, as losses typically are).
    initial_losses = jax.random.uniform(
        k1, (num_tasks,), dtype=jnp.float32, minval=0.1, maxval=2.0)
    final_losses = jax.random.uniform(
        k2, (num_tasks,), dtype=jnp.float32, minval=0.1, maxval=2.0)

    # Parameters: nn.Parameter(torch.tensor(-0.5)) per task (deterministic init).
    weights = jnp.full((num_tasks,), -0.5, dtype=jnp.float32)

    # Forward check.
    out = uncertainty_loss(initial_losses, final_losses, weights)
    out = jax.block_until_ready(out)
    ref = uncertainty_ref(initial_losses, final_losses, weights)
    assert jnp.allclose(out, ref, rtol=1e-5, atol=1e-5), (out, ref)

    # Gradient check (weights are learnable parameters in the PyTorch module).
    grad_kernel = jax.grad(uncertainty_loss, argnums=2)(
        initial_losses, final_losses, weights)
    grad_ref = jax.grad(uncertainty_ref, argnums=2)(
        initial_losses, final_losses, weights)
    grad_kernel = jax.block_until_ready(grad_kernel)
    assert jnp.allclose(grad_kernel, grad_ref, rtol=1e-5, atol=1e-5), (
        grad_kernel, grad_ref)

    print("KERNEL_OK")
</pallas_src>

<mosaic_0001>
module attributes {stable_mosaic.version = 11 : i64} {
  func.func @_uncertainty_kernel(%arg0: memref<3x4xf32, #tpu.memory_space<vmem>>, %arg1: memref<1x1xf32, #tpu.memory_space<smem>>) attributes {dimension_semantics = [], scalar_prefetch = 0 : i64, scratch_operands = 0 : i64, tpu.core_type = #tpu.core_type<tc>} {
    %c0 = arith.constant 0 : index
    %c0_0 = arith.constant 0 : index
    %0 = vector.load %arg0[%c0, %c0_0] : memref<3x4xf32, #tpu.memory_space<vmem>>, vector<1x4xf32>
    %c1 = arith.constant 1 : index
    %c0_1 = arith.constant 0 : index
    %1 = vector.load %arg0[%c1, %c0_1] : memref<3x4xf32, #tpu.memory_space<vmem>>, vector<1x4xf32>
    %c2 = arith.constant 2 : index
    %c0_2 = arith.constant 0 : index
    %2 = vector.load %arg0[%c2, %c0_2] : memref<3x4xf32, #tpu.memory_space<vmem>>, vector<1x4xf32>
    %3 = arith.addf %0, %1 : vector<1x4xf32>
    %cst = arith.constant 0.000000e+00 : f32
    %4 = vector.broadcast %cst : f32 to vector<1x4xf32>
    %5 = arith.subf %4, %2 : vector<1x4xf32>
    %6 = math.exp %5 : vector<1x4xf32>
    %cst_3 = arith.constant 5.000000e-01 : f32
    %7 = vector.broadcast %cst_3 : f32 to vector<1x4xf32>
    %8 = arith.mulf %7, %6 : vector<1x4xf32>
    %9 = arith.mulf %3, %8 : vector<1x4xf32>
    %10 = arith.addf %9, %2 : vector<1x4xf32>
    %11 = vector.shape_cast %10 : vector<1x4xf32> to vector<1x1x4xf32>
    %cst_4 = arith.constant dense<0.000000e+00> : vector<1xf32>
    %12 = vector.multi_reduction <add>, %11, %cst_4 [1, 2] : vector<1x1x4xf32> to vector<1xf32>
    %13 = vector.shape_cast %12 : vector<1xf32> to vector<1x1x1xf32>
    %14 = vector.extract %13[0, 0, 0] : f32 from vector<1x1x1xf32>
    %c0_5 = arith.constant 0 : index
    %c0_6 = arith.constant 0 : index
    %15 = memref.load %arg1[%c0_5, %c0_6] : memref<1x1xf32, #tpu.memory_space<smem>>
    memref.store %14, %arg1[%c0_5, %c0_6] : memref<1x1xf32, #tpu.memory_space<smem>>
    return
  }
}

</mosaic_0001>

<bundles_post_ra>
// kernel: tpu_custom_call.1
= control target key start
LH: loop header
LB: loop body
LE: loop exit
PB: predicated region body
PF: predicated region fallthrough
CT: control target
= control target key end

     0   :  { %6 = vsyncpa [#allocation3], 0  ;;  %s126_s0 = inlined_call_operand.hbm [shape: f32[3,4], index: 0, kind: input, shape index: {}]   ;;  %s127_s1 = inlined_call_operand.hbm [shape: f32[1,1], index: 1, kind: output, shape index: {}]  }
   0x1   :  { %7 = vsyncpa [#allocation4], 0  ;;  %s13_s8 = sshll.u32 %s126_s0, 4  ;;  %s108_s9 = smov [#allocation2]   ;;  %s14_s8 = int_to_ptr.hbm [resolvable:$true] %s13_s8 }
   0x2   :  { %s15_s10 = sshll.u32 %s108_s9, 4  ;;  %s16_s10 = int_to_ptr.vmem [resolvable:$true] %s15_s10 }
   0x3   :  { %18 = dma.hbm_to_vmem [thread:$0]  %s14_s8, 64, %s16_s10, [#allocation3]  }
   0x4   :  { %104 = dma.done.wait [#allocation3], 64  }
   0x5   :  { %105 = vsyncadd [#allocation3], 4294967232  ;;  %v25_v0 = vld [vmem:[#allocation2 + $0x2] sm:$0x1]  ;;  %v23_v3 = vld [vmem:[#allocation2] sm:$0x1] }
   0x6   :  { %v27_v1 = vsub.f32 0.0, %v25_v0  ;;  %v24_v4 = vld [vmem:[#allocation2 + $0x1] sm:$0x1]  ;;  %vm33_vm0 = vcmask 24576   ;;  %s51_s12 = sshll.u32 %s127_s1, 4  ;;  %s109_s14 = smov [#allocation5]   ;;  %s52_s12 = int_to_ptr.hbm [resolvable:$true] %s51_s12 }
   0x7   :  { %v26_v5 = vadd.f32 %v24_v4, %v23_v3 }
   0x8   :  { %v28_v2 = vmul.f32 1.442695, %v27_v1 }
   0xa   :  { %66 = vpow2.f32 %v28_v2 }
  0x10   :  { %v67_v6 = vpop.eup %66 }
  0x11   :  { %v30_v7 = vmul.f32 0.5, %v67_v6 }
  0x13   :  { %v31_v8 = vmul.f32 %v30_v7, %v26_v5 }
  0x15   :  { %v32_v9 = vadd.f32 %v31_v8, %v25_v0 }
  0x17   :  { %v34_v10 = vsel %vm33_vm0, %v32_v9, 0.0 }
  0x18   :  { %35 = vadd.xlane.f32.xlu0 %v34_v10 }
  0x8b   :  { %v36_v11 = vpop.xlane.xlu0 %35 }
  0x8c   :  { %v37_v12 = vrot.slane %v36_v11, 4 }
  0x8e   :  { %v38_v13 = vadd.f32 %v37_v12, %v36_v11 }
  0x90   :  { %v39_v14 = vrot.slane %v38_v13, 2 }
  0x92   :  { %v40_v15 = vadd.f32 %v39_v14, %v38_v13 }
  0x94   :  { %v41_v16 = vrot.slane %v40_v15, 1 }
  0x96   :  { %v42_v17 = vadd.f32 %v41_v16, %v40_v15 }
  0x98   :  { %62 = vpush %v42_v17 }
  0xc9   :  { %s63_s13 = spop %62 }
  0xca   :  { %45 = sst [smem:[#allocation5]] %s63_s13 }
  0xcb   :  { %54 = dma.smem_to_hbm %s109_s14, 16, %s52_s12, [#allocation4]  }
  0xcc   :  { %106 = dma.done.wait [#allocation4], 16  }
  0xcd   :  { %107 = vsyncadd [#allocation4], 4294967280 }
  0xce   :  { %59 = sfence }
  0xcf   :  { %60 = vsyncpa [#allocation3], 1 }
  0xd0   :  { %61 = vsyncpa [#allocation4], 1 }

</bundles_post_ra>
